<compile_context>
chip_gen: v6e
topology: v6e:2x2x1
jax: 0.10.0
libtpu: 0.0.40
codegen_flags: <defaults>
</compile_context>

<pallas_src>
import jax
import jax.numpy as jnp
from jax.experimental import pallas as pl
from jax.experimental.pallas import tpu as pltpu


def _point_outputs_kernel(rays_ref, times_ref, viewdirs_ref):
    rays = rays_ref[...]                      # (tn, C)
    tn, C = rays.shape
    P = times_ref.shape[1]

    t = rays[:, C - 1:C]                      # (tn, 1)  time = last ray column
    d = rays[:, 3:6]                          # (tn, 3)  view directions

    # Lane-dense, full-width stores (unmasked vst when widths are >=128-lane
    # aligned; block width always equals the full output width so the store is
    # a single contiguous slab either way).
    times_ref[...] = jnp.broadcast_to(t, (tn, P))        # (tn, P)
    # jnp.tile -> [dx,dy,dz, dx,dy,dz, ...]; a row-major reshape to (tn, P, 3)
    # in the wrapper reproduces repeat(1, P, 1).
    viewdirs_ref[...] = jnp.tile(d, (1, P))              # (tn, 3*P)


def _round_up(a, b):
    return ((a + b - 1) // b) * b


def add_point_outputs_pallas(rays, n_points, *, tile_n=None,
                             target_block_bytes=1 << 20,
                             vmem_budget_bytes=32 * 1024 * 1024):
    """rays: (N, C) with C >= 6 (origin3 + dir3 + ... + time).

    Returns (times (N, P, 1), viewdirs (N, P, 3)). Handles ragged N.
    """
    N, C = rays.shape
    P = int(n_points)
    itemsize = jnp.dtype(rays.dtype).itemsize

    # --- choose the ray-tile size -------------------------------------------
    # Per-row output footprint = times (P) + viewdirs (3P).
    row_out_bytes = max(4 * P * itemsize, 1)
    n_padded = _round_up(max(N, 1), 8)
    if tile_n is None:
        # Target ~1 MiB of output per block (amortizes the ~0.35us/step
        # pipeline overhead), multiple of 8 sublanes, no larger than N.
        tn = _round_up(max(target_block_bytes // row_out_bytes, 8), 8)
        tn = min(tn, n_padded)
    else:
        tn = min(_round_up(max(int(tile_n), 8), 8), n_padded)

    def block_bytes(t):
        # rays block + times block + viewdirs block (all lane-dense)
        return (t * C + t * P + t * 3 * P) * itemsize

    # Shrink until the double-buffered blocks fit the VMEM budget.
    while tn > 8 and 2 * block_bytes(tn) > vmem_budget_bytes:
        tn = max(8, _round_up(tn // 2, 8))

    grid = (pl.cdiv(N, tn),)

    out_shapes = (
        jax.ShapeDtypeStruct((N, P), rays.dtype),        # times (lane-dense)
        jax.ShapeDtypeStruct((N, 3 * P), rays.dtype),    # viewdirs (lane-dense)
    )

    grid_spec = pltpu.PrefetchScalarGridSpec(
        num_scalar_prefetch=0,
        grid=grid,
        in_specs=[pl.BlockSpec((tn, C), lambda i: (i, 0))],
        out_specs=[
            pl.BlockSpec((tn, P), lambda i: (i, 0)),
            pl.BlockSpec((tn, 3 * P), lambda i: (i, 0)),
        ],
    )

    vmem_limit = min(2 * block_bytes(tn) + (4 << 20), 64 << 20)

    times2d, view2d = pl.pallas_call(
        _point_outputs_kernel,
        out_shape=out_shapes,
        grid_spec=grid_spec,
        compiler_params=pltpu.CompilerParams(
            dimension_semantics=("parallel",),
            vmem_limit_bytes=int(vmem_limit)),
    )(rays)

    # Free row-major reshapes back to the module's output shapes.
    times = times2d.reshape(N, P, 1)
    viewdirs = view2d.reshape(N, P, 3)
    return times, viewdirs


class AddPointOutputsEmbedding:
    """JAX/Pallas port of nlf.embedding.point.AddPointOutputsEmbedding."""

    def __init__(self, in_channels, cfg, **kwargs):
        self.group = cfg.get('group', kwargs.get('group', 'embedding'))
        self.cfg = cfg
        self.rays_name = cfg.get('rays_name', 'rays')
        self.extra_outputs = list(cfg['extra_outputs'])
        self.cur_iter = 0

    def __call__(self, x, render_kwargs):
        rays = x[self.rays_name]
        n_points = x['points'].shape[1]

        need_times = 'times' in self.extra_outputs and 'times' not in x
        need_base = 'base_times' in self.extra_outputs and 'base_times' not in x
        need_view = 'viewdirs' in self.extra_outputs and 'viewdirs' not in x

        if need_times or need_base or need_view:
            times, viewdirs = add_point_outputs_pallas(rays, n_points)
            if need_times:
                x['times'] = times
            if need_base:
                # Identical values to `times`; alias instead of writing a
                # second copy to HBM (JAX arrays are immutable, so this is safe).
                x['base_times'] = times
            if need_view:
                x['viewdirs'] = viewdirs
        return x

    def set_iter(self, i):
        self.cur_iter = i


def _check(rays, points):
    N, C = rays.shape
    P = points.shape[1]
    cfg = {'extra_outputs': ['times', 'base_times', 'viewdirs'],
           'rays_name': 'rays'}
    module = AddPointOutputsEmbedding(in_channels=C, cfg=cfg)
    x = {'rays': rays, 'points': points}
    out = module(x, render_kwargs={})
    jax.block_until_ready((out['times'], out['base_times'], out['viewdirs']))

    ref_times = jnp.broadcast_to(rays[:, None, -1:], (N, P, 1))
    ref_view = jnp.broadcast_to(rays[:, None, 3:6], (N, P, 3))
    assert out['times'].shape == (N, P, 1)
    assert out['base_times'].shape == (N, P, 1)
    assert out['viewdirs'].shape == (N, P, 3)
    assert jnp.allclose(out['times'], ref_times)
    assert jnp.allclose(out['base_times'], ref_times)
    assert jnp.allclose(out['viewdirs'], ref_view)
    assert 'points' in out and 'rays' in out  # pass-through keys preserved


if __name__ == "__main__":
    key = jax.random.PRNGKey(0)
    k1, k2, k3, k4 = jax.random.split(key, 4)

    # Small main case: 8 rays, 8 ray channels (origin3+dir3+near1+time1), 16 pts/ray.
    N, C, P = 8, 8, 16
    _check(jax.random.normal(k1, (N, C), dtype=jnp.float32),
           jax.random.normal(k2, (N, P, 3), dtype=jnp.float32))

    # Ragged case (N not a multiple of the sublane tile) exercises the masked
    # partial last grid block.
    N2, P2 = 10, 24
    _check(jax.random.normal(k3, (N2, C), dtype=jnp.float32),
           jax.random.normal(k4, (N2, P2, 3), dtype=jnp.float32))

    print("KERNEL_OK")
</pallas_src>

<mosaic_0001>
module attributes {stable_mosaic.version = 11 : i64} {
  func.func @_point_outputs_kernel(%arg0: i32, %arg1: memref<8x8xf32, #tpu.memory_space<vmem>>, %arg2: memref<8x16xf32, #tpu.memory_space<vmem>>, %arg3: memref<8x48xf32, #tpu.memory_space<vmem>>) attributes {dimension_semantics = [#tpu.dimension_semantics<parallel>], iteration_bounds = array<i64: 1>, scalar_prefetch = 0 : i64, scratch_operands = 0 : i64, tpu.core_type = #tpu.core_type<tc>, window_params = [{transform_indices = @transform_0, window_bounds = array<i64: 8, 8>}, {transform_indices = @transform_1, window_bounds = array<i64: 8, 16>}, {transform_indices = @transform_2, window_bounds = array<i64: 8, 48>}]} {
    %c0 = arith.constant 0 : index
    %c0_0 = arith.constant 0 : index
    %0 = vector.load %arg1[%c0, %c0_0] : memref<8x8xf32, #tpu.memory_space<vmem>>, vector<8x8xf32>
    %1 = vector.extract_strided_slice %0 {offsets = [0, 7], sizes = [8, 1], strides = [1, 1]} : vector<8x8xf32> to vector<8x1xf32>
    %2 = vector.extract_strided_slice %0 {offsets = [0, 3], sizes = [8, 3], strides = [1, 1]} : vector<8x8xf32> to vector<8x3xf32>
    %3 = vector.shape_cast %1 : vector<8x1xf32> to vector<8x1xf32>
    %4 = vector.broadcast %3 : vector<8x1xf32> to vector<8x16xf32>
    %c0_1 = arith.constant 0 : index
    %c0_2 = arith.constant 0 : index
    %5 = vector.load %arg2[%c0_1, %c0_2] : memref<8x16xf32, #tpu.memory_space<vmem>>, vector<8x16xf32>
    tpu.vector_store %arg2[%c0_1, %c0_2], %4 {strides = array<i32>} : memref<8x16xf32, #tpu.memory_space<vmem>>, vector<8x16xf32>,
    %6 = tpu.concatenate %2, %2, %2, %2, %2, %2, %2, %2, %2, %2, %2, %2, %2, %2, %2, %2 in 1 : vector<8x3xf32>, vector<8x3xf32>, vector<8x3xf32>, vector<8x3xf32>, vector<8x3xf32>, vector<8x3xf32>, vector<8x3xf32>, vector<8x3xf32>, vector<8x3xf32>, vector<8x3xf32>, vector<8x3xf32>, vector<8x3xf32>, vector<8x3xf32>, vector<8x3xf32>, vector<8x3xf32>, vector<8x3xf32> -> vector<8x48xf32>
    %c0_3 = arith.constant 0 : index
    %c0_4 = arith.constant 0 : index
    %7 = vector.load %arg3[%c0_3, %c0_4] : memref<8x48xf32, #tpu.memory_space<vmem>>, vector<8x48xf32>
    tpu.vector_store %arg3[%c0_3, %c0_4], %6 {strides = array<i32>} : memref<8x48xf32, #tpu.memory_space<vmem>>, vector<8x48xf32>,
    return
  }
  func.func @transform_0(%arg0: i32) -> (i32, i32) {
    %c0_i32 = arith.constant 0 : i32
    %c0_i32_0 = arith.constant 0 : i32
    return %arg0, %c0_i32 : i32, i32
  }
  func.func @transform_1(%arg0: i32) -> (i32, i32) {
    %c0_i32 = arith.constant 0 : i32
    %c0_i32_0 = arith.constant 0 : i32
    return %arg0, %c0_i32 : i32, i32
  }
  func.func @transform_2(%arg0: i32) -> (i32, i32) {
    %c0_i32 = arith.constant 0 : i32
    %c0_i32_0 = arith.constant 0 : i32
    return %arg0, %c0_i32 : i32, i32
  }
}

</mosaic_0001>

<bundles_post_ra>
// kernel: tpu_custom_call.1
= control target key start
LH: loop header
LB: loop body
LE: loop exit
PB: predicated region body
PF: predicated region fallthrough
CT: control target
= control target key end

     0   :  { %8 = vsyncpa [#allocation3], 0  ;;  %s267_s0 = inlined_call_operand.hbm [shape: f32[8,8], index: 0, kind: input, shape index: {}]   ;;  %s268_s1 = inlined_call_operand.hbm [shape: f32[8,16], index: 1, kind: output, shape index: {0}]   ;;  %s269_s2 = inlined_call_operand.hbm [shape: f32[8,48], index: 2, kind: output, shape index: {1}]  }
   0x1   :  { %9 = vsyncpa [#allocation4], 0 }
   0x2   :  { %10 = vsyncpa [#allocation7], 0  ;;  %s224_s9 = smov [#allocation2]  }
   0x3   :  { %s17_s10 = sshll.u32 %s224_s9, 4  ;;  %s18_s10 = int_to_ptr.vmem [resolvable:$true] %s17_s10 }
   0x4   :  { %s166_s11 = scalar_lea.vmem %s18_s10, 128  ;;  %p171_p1 = scmp.lt.s32.totalorder %s18_s10, %s18_s10 }
   0x5   :  { %p167_p0 = scmp.ne.s32.totalorder %s18_s10, %s166_s11  ;;  %p172_p2 = scmp.lt.s32.totalorder %s166_s11, %s166_s11 }
   0x7   :  { %p173_p3 = por %p172_p2, %p171_p1 }
   0x9   :  { %p174_p4 = pnand %p173_p3, %p167_p0 }
   0xb   :  { %177 = shalt.err (!%p174_p4)
}
   0xc   :  { %20 = dma.hbm_to_vmem [thread:$0]  %s267_s0, 128, %s18_s10, [#allocation3]  }
   0xd   :  { %218 = dma.done.wait [#allocation3], 128  }
   0xe   :  { %219 = vsyncadd [#allocation3], 4294967168  ;;  %v225_v0 = vmov 7   ;;  %v24_v1 = vld [vmem:[#allocation2] sm:$0xff]  ;;  %s226_s14 = smov 6   ;;  %s227_s15 = smov 125  }
   0xf   :  { %157 = vset.pattern.permute.xlu0 %v225_v0  ;;  %38 = vrot.lane.b32.xlu1 %v24_v1, %s226_s14  ;;  %s228_s16 = smov 9   ;;  %s229_s17 = smov 3   ;;  %vm77_vm0 = vcmask 23552   ;;  %vm79_vm1 = vcmask 48128   ;;  %vm81_vm2 = vcmask 72704   ;;  %vm83_vm3 = vcmask 97280  }
  0x10   :  { %32 = vrot.lane.b32.xlu0 %v24_v1, %s227_s15  ;;  %s230_s18 = smov 15   ;;  %s231_s19 = smov 12   ;;  %vm85_vm4 = vcmask 121856   ;;  %vm87_vm5 = vcmask 146432   ;;  %vm89_vm6 = vcmask 171008   ;;  %vm91_vm7 = vcmask 195584  }
  0x11   :  { %s232_s20 = smov 21   ;;  %s233_s0 = smov 18   ;;  %vm93_vm8 = vcmask 220160   ;;  %vm30_vm9 = vcmask 130048   ;;  %vm95_vm10 = vcmask 244736   ;;  %vm97_vm11 = vcmask 269312  }
  0x12   :  { %s234_s21 = smov 27   ;;  %s235_s22 = smov 24   ;;  %vm99_vm12 = vcmask 293888   ;;  %vm101_vm13 = vcmask 318464  }
  0x13   :  { %41 = vrot.lane.b32.xlu1 %v24_v1, %s228_s16  ;;  %s236_s23 = smov 30   ;;  %s237_s24 = smov 33  }
  0x14   :  { %35 = vrot.lane.b32.xlu0 %v24_v1, %s229_s17  ;;  %s238_s25 = smov 36   ;;  %s239_s26 = smov 39  }
  0x15   :  { %s240_s27 = smov 42   ;;  %s241_s28 = smov [#allocation5]  }
  0x16   :  { %s115_s29 = sshll.u32 %s241_s28, 4  ;;  %s116_s29 = int_to_ptr.vmem [resolvable:$true] %s115_s29 }
  0x17   :  { %47 = vrot.lane.b32.xlu1 %v24_v1, %s230_s18  ;;  %s178_s30 = scalar_lea.vmem %s116_s29, 128  ;;  %p183_p6 = scmp.lt.s32.totalorder %s116_s29, %s116_s29 }
  0x18   :  { %44 = vrot.lane.b32.xlu0 %v24_v1, %s231_s19  ;;  %p179_p5 = scmp.ne.s32.totalorder %s116_s29, %s178_s30  ;;  %p184_p7 = scmp.lt.s32.totalorder %s178_s30, %s178_s30 }
  0x1a   :  { %p185_p8 = por %p184_p7, %p183_p6 }
  0x1b   :  { %53 = vrot.lane.b32.xlu1 %v24_v1, %s232_s20 }
  0x1c   :  { %50 = vrot.lane.b32.xlu0 %v24_v1, %s233_s0  ;;  %p186_p9 = pnand %p185_p8, %p179_p5 }
  0x1f   :  { %59 = vrot.lane.b32.xlu1 %v24_v1, %s234_s21 }
  0x20   :  { %56 = vrot.lane.b32.xlu0 %v24_v1, %s235_s22 }
  0x23   :  { %62 = vrot.lane.b32.xlu1 %v24_v1, %s236_s23 }
  0x24   :  { %27 = vperm.xlu0 %157, %v24_v1  }
  0x27   :  { %65 = vrot.lane.b32.xlu1 %v24_v1, %s237_s24 }
  0x28   :  { %68 = vrot.lane.b32.xlu0 %v24_v1, %s238_s25 }
  0x2b   :  { %71 = vrot.lane.b32.xlu1 %v24_v1, %s239_s26 }
  0x2c   :  { %74 = vrot.lane.b32.xlu0 %v24_v1, %s240_s27 }
  0x81   :  { %v39_v2 = vpop.permute.xlu1 %38 }
  0x82   :  { %v33_v3 = vpop.permute.xlu0 %32 }
  0x83   :  { %v78_v7 = vsel %vm77_vm0, %v33_v3, %v24_v1 }
  0x85   :  { %v42_v4 = vpop.permute.xlu1 %41 }
  0x86   :  { %v36_v5 = vpop.permute.xlu0 %35 }
  0x87   :  { %v80_v8 = vsel %vm79_vm1, %v78_v7, %v36_v5 }
  0x88   :  { %v82_v11 = vsel %vm81_vm2, %v80_v8, %v39_v2 }
  0x89   :  { %v48_v6 = vpop.permute.xlu1 %47  ;;  %v84_v12 = vsel %vm83_vm3, %v82_v11, %v42_v4 }
  0x8a   :  { %v45_v10 = vpop.permute.xlu0 %44 }
  0x8b   :  { %v86_v15 = vsel %vm85_vm4, %v84_v12, %v45_v10 }
  0x8c   :  { %v88_v16 = vsel %vm87_vm5, %v86_v15, %v48_v6 }
  0x8d   :  { %v54_v9 = vpop.permute.xlu1 %53 }
  0x8e   :  { %v51_v14 = vpop.permute.xlu0 %50 }
  0x8f   :  { %v90_v17 = vsel %vm89_vm6, %v88_v16, %v51_v14 }
  0x90   :  { %v92_v20 = vsel %vm91_vm7, %v90_v17, %v54_v9 }
  0x91   :  { %v60_v13 = vpop.permute.xlu1 %59 }
  0x92   :  { %v57_v19 = vpop.permute.xlu0 %56 }
  0x93   :  { %v94_v21 = vsel %vm93_vm8, %v92_v20, %v57_v19 }
  0x94   :  { %v96_v24 = vsel %vm95_vm10, %v94_v21, %v60_v13 }
  0x95   :  { %v63_v18 = vpop.permute.xlu1 %62 }
  0x99   :  { %v66_v23 = vpop.permute.xlu1 %65 }
  0x9f   :  { %v28_v22 = vpop.permute.xlu0 %27 }
  0xa0   :  { %31 = vst.msk [vmem:[#allocation5] sm:$0xff] %vm30_vm9, %v28_v22 }
  0xa1   :  { %189 = shalt.err (!%p186_p9)
}
  0xa2   :  { %118 = dma.vmem_to_hbm [thread:$0]  %s116_s29, 128, %s268_s1, [#allocation4]   ;;  %v98_v25 = vsel %vm97_vm11, %v96_v24, %v63_v18  ;;  %vm103_vm14 = vcmask 343040   ;;  %v72_v29 = vpop.permute.xlu1 %71  ;;  %vm105_vm15 = vcmask 367616   ;;  %vm107_vm0 = vcmask 392192  }
  0xa3   :  { %v100_v26 = vsel %vm99_vm12, %v98_v25, %v66_v23  ;;  %v69_v27 = vpop.permute.xlu0 %68  ;;  %s242_s5 = smov [#allocation6]  }
  0xa4   :  { %v102_v28 = vsel %vm101_vm13, %v100_v26, %v69_v27  ;;  %s125_s6 = sshll.u32 %s242_s5, 4  ;;  %s126_s6 = int_to_ptr.vmem [resolvable:$true] %s125_s6 }
  0xa5   :  { %v104_v30 = vsel %vm103_vm14, %v102_v28, %v72_v29  ;;  %s198_s7 = scalar_lea.vmem %s126_s6, 128  ;;  %p203_p11 = scmp.lt.s32.totalorder %s126_s6, %s126_s6 }
  0xa6   :  { %p199_p10 = scmp.ne.s32.totalorder %s126_s6, %s198_s7  ;;  %p204_p12 = scmp.lt.s32.totalorder %s198_s7, %s198_s7 }
  0xa7   :  { %v75_v31 = vpop.permute.xlu0 %74 }
  0xa8   :  { %v106_v32 = vsel %vm105_vm15, %v104_v30, %v75_v31  ;;  %p205_p13 = por %p204_p12, %p203_p11 }
  0xa9   :  { %108 = vst.msk [vmem:[#allocation6] sm:$0xff] %vm107_vm0, %v106_v32 }
  0xaa   :  { %p206_p0 = pnand %p205_p13, %p199_p10 }
  0xac   :  { %209 = shalt.err (!%p206_p0)
}
  0xad   :  { %128 = dma.vmem_to_hbm [thread:$0]  %s126_s6, 128, %s269_s2, [#allocation7]  }
  0xae   :  { %220 = dma.done.wait [#allocation4], 128  }
  0xaf   :  { %221 = vsyncadd [#allocation4], 4294967168 }
  0xb0   :  { %222 = dma.done.wait [#allocation7], 128  }
  0xb1   :  { %223 = vsyncadd [#allocation7], 4294967168 }
  0xb2   :  { %135 = vsyncpa [#allocation3], 1 }
  0xb3   :  { %136 = vsyncpa [#allocation4], 1 }
  0xb4   :  { %137 = vsyncpa [#allocation7], 1 }

</bundles_post_ra>
